<compile_context>
chip_gen: v5e
topology: v5e:2x2
jax: 0.10.0
libtpu: 0.0.40
codegen_flags: <defaults>
</compile_context>

<pallas_src>
import jax
import jax.numpy as jnp
from jax.experimental import pallas as pl
from jax.experimental.pallas import tpu as pltpu


def _round_up(a, b):
    return ((a + b - 1) // b) * b


def _abs_maxpool_kernel(x_ref, o_ref):
    # x_ref: (kh*kw, Rt, C)  -- window element on the leading (untiled) axis
    # o_ref: (Rt, C)
    x = x_ref[...]
    pos = jnp.max(x, axis=0)          # maxpool(x)
    mn = jnp.min(x, axis=0)           # == -maxpool(-x)
    # torch.where(pos_pool >= neg_pool, pos_pool, -neg_pool), with neg_pool = -mn
    o_ref[...] = jnp.where(pos >= -mn, pos, mn)


def abs_max_pool2d(x, kernel_size=2, stride=None, *, block_rows=512, block_cols=512):
    """Forward of AbsPool(nn.MaxPool2d, kernel_size). x is NCHW."""
    if stride is None:
        stride = kernel_size
    assert stride == kernel_size, "only non-overlapping (stride == kernel) pooling implemented"
    B, C, H, W = x.shape
    kh = kw = kernel_size
    Ho, Wo = H // kh, W // kw
    kk = kh * kw
    n_out = B * C * Ho * Wo

    # --- glue (plain JAX): unfold kh x kw windows -> window-major (kk, n_out) ---
    xw = x[:, :, : Ho * kh, : Wo * kw].reshape(B, C, Ho, kh, Wo, kw)
    xw = jnp.transpose(xw, (3, 5, 0, 1, 2, 4)).reshape(kk, n_out)

    # --- lane-dense 2-D tiling of the flattened output axis ---
    col = min(block_cols, _round_up(n_out, 128))        # lane tile, multiple of 128
    rows = -(-n_out // col)                             # cdiv
    row_t = min(block_rows, _round_up(rows, 8))         # sublane tile, multiple of 8
    rows_pad = _round_up(rows, row_t)
    n_pad = rows_pad * col
    if n_pad != n_out:
        xw = jnp.pad(xw, ((0, 0), (0, n_pad - n_out)))
    xw3 = xw.reshape(kk, rows_pad, col)

    grid = (rows_pad // row_t,)
    out2d = pl.pallas_call(
        _abs_maxpool_kernel,
        out_shape=jax.ShapeDtypeStruct((rows_pad, col), x.dtype),
        grid=grid,
        in_specs=[pl.BlockSpec((kk, row_t, col), lambda i: (0, i, 0))],
        out_specs=pl.BlockSpec((row_t, col), lambda i: (i, 0)),
        compiler_params=pltpu.CompilerParams(
            dimension_semantics=("parallel",),     # shard tiles across TCs (v7x)
            vmem_limit_bytes=32 * 1024 * 1024,     # plenty of headroom, safe on v5e..v7x
            allow_input_fusion=[True],             # fuse the unfold relayout into input DMA
        ),
    )(xw3)

    out_flat = out2d.reshape(n_pad)[:n_out]
    return out_flat.reshape(B, C, Ho, Wo)


if __name__ == "__main__":
    key = jax.random.PRNGKey(0)
    x = jax.random.normal(key, (2, 4, 16, 16), dtype=jnp.float32)  # NCHW

    y = jax.block_until_ready(abs_max_pool2d(x, kernel_size=2))

    # pure-JAX reference mirroring PyTorch AbsPool(nn.MaxPool2d(2))
    xr = x.reshape(2, 4, 8, 2, 8, 2)
    pos = jnp.max(xr, axis=(3, 5))
    neg = jnp.max(-xr, axis=(3, 5))
    ref = jnp.where(pos >= neg, pos, -neg)

    assert y.shape == (2, 4, 8, 8), y.shape
    assert y.dtype == x.dtype
    assert jnp.allclose(y, ref), "mismatch vs reference"
    print("KERNEL_OK")
</pallas_src>

<mosaic_0001>
module attributes {stable_mosaic.version = 11 : i64} {
  func.func @_abs_maxpool_kernel(%arg0: i32, %arg1: memref<4x8x512xf32, #tpu.memory_space<vmem>>, %arg2: memref<8x512xf32, #tpu.memory_space<vmem>>) attributes {dimension_semantics = [#tpu.dimension_semantics<parallel>], iteration_bounds = array<i64: 1>, scalar_prefetch = 0 : i64, scratch_operands = 0 : i64, tpu.core_type = #tpu.core_type<tc>, window_params = [{transform_indices = @transform_0, window_bounds = array<i64: 4, 8, 512>}, {transform_indices = @transform_1, window_bounds = array<i64: 8, 512>}]} {
    %c0 = arith.constant 0 : index
    %c0_0 = arith.constant 0 : index
    %c0_1 = arith.constant 0 : index
    %0 = vector.load %arg1[%c0, %c0_0, %c0_1] : memref<4x8x512xf32, #tpu.memory_space<vmem>>, vector<4x8x512xf32>
    %cst = arith.constant dense<0xFF800000> : vector<8x512xf32>
    %1 = vector.multi_reduction <maximumf>, %0, %cst [0] : vector<4x8x512xf32> to vector<8x512xf32>
    %cst_2 = arith.constant dense<0x7F800000> : vector<8x512xf32>
    %2 = vector.multi_reduction <minimumf>, %0, %cst_2 [0] : vector<4x8x512xf32> to vector<8x512xf32>
    %cst_3 = arith.constant 0.000000e+00 : f32
    %3 = vector.broadcast %cst_3 : f32 to vector<8x512xf32>
    %4 = arith.subf %3, %2 : vector<8x512xf32>
    %5 = arith.cmpf oge, %1, %4 : vector<8x512xf32>
    %6 = arith.select %5, %1, %2 : vector<8x512xi1>, vector<8x512xf32>
    %c0_4 = arith.constant 0 : index
    %c0_5 = arith.constant 0 : index
    %7 = vector.load %arg2[%c0_4, %c0_5] : memref<8x512xf32, #tpu.memory_space<vmem>>, vector<8x512xf32>
    tpu.vector_store %arg2[%c0_4, %c0_5], %6 {strides = array<i32>} : memref<8x512xf32, #tpu.memory_space<vmem>>, vector<8x512xf32>,
    return
  }
  func.func @transform_0(%arg0: i32) -> (i32, i32, i32) {
    %c0_i32 = arith.constant 0 : i32
    %c0_i32_0 = arith.constant 0 : i32
    %c0_i32_1 = arith.constant 0 : i32
    return %c0_i32, %arg0, %c0_i32_0 : i32, i32, i32
  }
  func.func @transform_1(%arg0: i32) -> (i32, i32) {
    %c0_i32 = arith.constant 0 : i32
    %c0_i32_0 = arith.constant 0 : i32
    return %arg0, %c0_i32 : i32, i32
  }
}

</mosaic_0001>

<bundles_post_ra>
// kernel: tpu_custom_call.1
= control target key start
LH: loop header
LB: loop body
LE: loop exit
PB: predicated region body
PF: predicated region fallthrough
CT: control target
= control target key end

     0   :  { %6 = vsyncpa [#allocation3], 0  ;;  %s174_s0 = inlined_call_operand.hbm [shape: f32[4,8,512], index: 0, kind: input, shape index: {}]   ;;  %s175_s1 = inlined_call_operand.hbm [shape: f32[8,512], index: 1, kind: output, shape index: {}]  }
   0x1   :  { %7 = vsyncpa [#allocation4], 0  ;;  %s12_s8 = sshll.u32 %s174_s0, 4  ;;  %s154_s9 = smov [#allocation2]   ;;  %s13_s8 = int_to_ptr.hbm [resolvable:$true] %s12_s8 }
   0x2   :  { %s14_s10 = sshll.u32 %s154_s9, 4  ;;  %s155_s11 = smov 512   ;;  %s15_s10 = int_to_ptr.vmem [resolvable:$true] %s14_s10 }
   0x3   :  { %s156_s12 = smov 32  }
   0x4   :  { %20 = dma.hbm_to_vmem [thread:$0]  %s13_s8, 2048, %s15_s10, [#allocation3], %s155_s11, %s155_s11, %s156_s12  }
   0x5   :  { %150 = dma.done.wait [#allocation3], 2048  }
   0x6   :  { %151 = vsyncadd [#allocation3], 4294965248  ;;  %v25_v0 = vld [vmem:[#allocation2] sm:$0xff]  ;;  %v26_v5 = vld [vmem:[#allocation2 + $0x8] sm:$0xff]  ;;  %s157_s0 = smov [#allocation5]   ;;  %s88_s16 = sshll.u32 %s175_s1, 4  ;;  %s89_s16 = int_to_ptr.hbm [resolvable:$true] %s88_s16 }
   0x7   :  { %v29_v1 = vld [vmem:[#allocation2 + $0x20] sm:$0xff]  ;;  %v30_v6 = vld [vmem:[#allocation2 + $0x28] sm:$0xff]  ;;  %v27_v11 = vld [vmem:[#allocation2 + $0x10] sm:$0xff]  ;;  %s86_s13 = sshll.u32 %s157_s0, 4  ;;  %s87_s13 = int_to_ptr.vmem [resolvable:$true] %s86_s13 }
   0x8   :  { %v33_v2 = vld [vmem:[#allocation2 + $0x40] sm:$0xff]  ;;  %v41_v3 = vmax.f32 %v25_v0, %v29_v1  ;;  %v53_v4 = vmin.f32 %v25_v0, %v29_v1  ;;  %v34_v8 = vld [vmem:[#allocation2 + $0x48] sm:$0xff]  ;;  %v44_v9 = vmax.f32 %v26_v5, %v30_v6  ;;  %v56_v10 = vmin.f32 %v26_v5, %v30_v6  ;;  %v31_v15 = vld [vmem:[#allocation2 + $0x30] sm:$0xff] }
   0x9   :  { %v37_v7 = vld [vmem:[#allocation2 + $0x60] sm:$0xff]  ;;  %v38_v14 = vld [vmem:[#allocation2 + $0x68] sm:$0xff]  ;;  %v35_v16 = vld [vmem:[#allocation2 + $0x50] sm:$0xff]  ;;  %v47_v19 = vmax.f32 %v27_v11, %v31_v15  ;;  %v59_v20 = vmin.f32 %v27_v11, %v31_v15 }
   0xa   :  { %v42_v12 = vmax.f32 %v41_v3, %v33_v2  ;;  %v54_v13 = vmin.f32 %v53_v4, %v33_v2  ;;  %v45_v17 = vmax.f32 %v44_v9, %v34_v8  ;;  %v57_v18 = vmin.f32 %v56_v10, %v34_v8  ;;  %v28_v21 = vld [vmem:[#allocation2 + $0x18] sm:$0xff]  ;;  %v39_v26 = vld [vmem:[#allocation2 + $0x70] sm:$0xff] }
   0xb   :  { %v32_v22 = vld [vmem:[#allocation2 + $0x38] sm:$0xff]  ;;  %v48_v31 = vmax.f32 %v47_v19, %v35_v16  ;;  %v60_v32 = vmin.f32 %v59_v20, %v35_v16 }
   0xc   :  { %v36_v23 = vld [vmem:[#allocation2 + $0x58] sm:$0xff]  ;;  %v43_v24 = vmax.f32 %v42_v12, %v37_v7  ;;  %v55_v25 = vmin.f32 %v54_v13, %v37_v7  ;;  %v50_v27 = vmax.f32 %v28_v21, %v32_v22  ;;  %v62_v28 = vmin.f32 %v28_v21, %v32_v22 }
   0xd   :  { %v46_v29 = vmax.f32 %v45_v17, %v38_v14  ;;  %v58_v30 = vmin.f32 %v57_v18, %v38_v14  ;;  %v40_v33 = vld [vmem:[#allocation2 + $0x78] sm:$0xff]  ;;  %v49_v38 = vmax.f32 %v48_v31, %v39_v26  ;;  %v61_v39 = vmin.f32 %v60_v32, %v39_v26 }
   0xe   :  { %v65_v34 = vsub.f32 0.0, %v55_v25  ;;  %v51_v35 = vmax.f32 %v50_v27, %v36_v23  ;;  %v63_v36 = vmin.f32 %v62_v28, %v36_v23 }
   0xf   :  { %v66_v37 = vsub.f32 0.0, %v58_v30  ;;  %v67_v43 = vsub.f32 0.0, %v61_v39 }
  0x10   :  { %vm69_vm0 = vcmp.ge.f32.partialorder %v43_v24, %v65_v34  ;;  %v52_v40 = vmax.f32 %v51_v35, %v40_v33  ;;  %v64_v41 = vmin.f32 %v63_v36, %v40_v33 }
  0x11   :  { %v73_v42 = vsel %vm69_vm0, %v43_v24, %v55_v25  ;;  %vm70_vm1 = vcmp.ge.f32.partialorder %v46_v29, %v66_v37  ;;  %vm71_vm2 = vcmp.ge.f32.partialorder %v49_v38, %v67_v43 }
  0x12   :  { %77 = vst [vmem:[#allocation5] sm:$0xff] %v73_v42  ;;  %v74_v44 = vsel %vm70_vm1, %v46_v29, %v58_v30  ;;  %v68_v45 = vsub.f32 0.0, %v64_v41  ;;  %v75_v46 = vsel %vm71_vm2, %v49_v38, %v61_v39 }
  0x13   :  { %78 = vst [vmem:[#allocation5 + $0x8] sm:$0xff] %v74_v44 }
  0x14   :  { %vm72_vm3 = vcmp.ge.f32.partialorder %v52_v40, %v68_v45  ;;  %79 = vst [vmem:[#allocation5 + $0x10] sm:$0xff] %v75_v46 }
  0x15   :  { %v76_v47 = vsel %vm72_vm3, %v52_v40, %v64_v41 }
  0x16   :  { %80 = vst [vmem:[#allocation5 + $0x18] sm:$0xff] %v76_v47 }
  0x17   :  { %91 = dma.vmem_to_hbm [thread:$0]  %s87_s13, 512, %s89_s16, [#allocation4]  }
  0x18   :  { %152 = dma.done.wait [#allocation4], 512  }
  0x19   :  { %153 = vsyncadd [#allocation4], 4294966784 }
  0x1a   :  { %96 = vsyncpa [#allocation3], 1 }
  0x1b   :  { %97 = vsyncpa [#allocation4], 1 }

</bundles_post_ra>
